<compile_context>
chip_gen: v5e
topology: v5e:2x2
jax: 0.10.0
libtpu: 0.0.40
codegen_flags: <defaults>
</compile_context>

<pallas_src>
import functools

import jax
import jax.numpy as jnp
from jax import lax
from jax.experimental import pallas as pl
from jax.experimental.pallas import tpu as pltpu


def mlp_kernel(alpha_ref,                       # SMEM (3,) PReLU slopes (f32)
               x_ref,                           # (bm, OBS)   input dtype
               w1_ref, b1_ref,                  # (H,  OBS),  (H,  1)
               w2_ref, b2_ref,                  # (H2, H),    (H2, 1)
               w3_ref, b3_ref,                  # (H4, H2),   (H4, 1)
               w4_ref, b4_ref,                  # (A,  H4),   (A,  1)
               o_ref,                           # (A,  bm)    f32
               *, chunk, n_chunks):
    # Hoist SMEM scalar reads off the critical path.
    a0 = alpha_ref[0]
    a1 = alpha_ref[1]
    a2 = alpha_ref[2]

    cd = w1_ref.dtype                           # MXU operand (compute) dtype

    # Weights/biases are tiny; load once per kernel invocation.
    w1 = w1_ref[...]; b1 = b1_ref[...]
    w2 = w2_ref[...]; b2 = b2_ref[...]
    w3 = w3_ref[...]; b3 = b3_ref[...]
    w4 = w4_ref[...]; b4 = b4_ref[...]

    # Contract w1's in_features (axis 1) with x's obs axis (axis 1):
    # (H, obs) x (chunk, obs) -> (H, chunk).  Batch lands on lanes.
    dn = (((1,), (1,)), ((), ()))

    # Static chunk loop: run the full 4-layer chain per lane chunk so the
    # (feat, chunk) intermediates stay in vregs between layers.
    for j in range(n_chunks):
        xs = x_ref[pl.ds(j * chunk, chunk), :].astype(cd)        # (chunk, obs)

        h = lax.dot_general(w1, xs, dn, preferred_element_type=jnp.float32) + b1
        h = jnp.where(h > 0, h, a0 * h)                          # PReLU (f32)

        h = jnp.dot(w2, h.astype(cd), preferred_element_type=jnp.float32) + b2
        h = jnp.where(h > 0, h, a1 * h)

        h = jnp.dot(w3, h.astype(cd), preferred_element_type=jnp.float32) + b3
        h = jnp.where(h > 0, h, a2 * h)

        out = jnp.dot(w4, h.astype(cd), preferred_element_type=jnp.float32) + b4
        # Lane-dense store: (A, chunk) with chunk a multiple of 128 (or = bm).
        o_ref[:, pl.ds(j * chunk, chunk)] = out.astype(o_ref.dtype)


# Batch tiles up to 8192 rows: ~0.5 MiB of real x data per step (f32, obs=16),
# and the lane-padded double-buffered VMEM footprint stays ~8-9 MiB (safe on
# v5e/v6e/v7x with the 32 MiB scoped-VMEM limit set below).
_TILE_CANDIDATES = (8192, 4096, 2048, 1024, 512, 256, 128)


def _pick_batch_tile(B):
    """Largest lane-aligned tile, preferring >=4 grid steps (>=2 per v7x TC),
    then >=2 (pipelining on 1-TC chips), then a single full-size block."""
    for min_steps in (4, 2):
        for cand in _TILE_CANDIDATES:
            if B % cand == 0 and B // cand >= min_steps:
                return cand
    return B  # small / odd batch: block == full dim (legal, grid=(1,))


def _pick_chunk(bm):
    """Lane sub-chunk for the in-kernel layer chain (256-512 sweet spot)."""
    for c in (512, 256, 128):
        if bm % c == 0:
            return c
    return bm


def _policy_forward(x, params, *, block_b=None):
    """Fused MLP forward pass.  x: (B, obs).  Returns (B, A) float32.

    `params` should come from prepare_params(); weights already in the MXU
    compute dtype (bf16 by default), biases / PReLU slopes in f32.
    """
    alphas, (w1, b1), (w2, b2), (w3, b3), (w4, b4) = params
    B, obs = x.shape
    H, H2, H4, A = w1.shape[0], w2.shape[0], w3.shape[0], w4.shape[0]

    bm = _pick_batch_tile(B) if block_b is None else block_b
    assert B % bm == 0, "batch must be divisible by the batch tile"
    # Lane axis of the output block must be a multiple of 128 or the full
    # extent; same for the sublane axis of the (bm, obs) x block.
    assert bm == B or bm % 128 == 0, "block_b must be a multiple of 128 (or B)"
    chunk = _pick_chunk(bm)
    n_chunks = bm // chunk

    # Weights/biases are resident in VMEM (constant index_map -> DMA'd once).
    resident = lambda shape: pl.BlockSpec(shape, lambda i: (0, 0))

    flops = 2 * B * (obs * H + H * H2 + H2 * H4 + H4 * A) + 4 * B * (H + H2 + H4)
    bytes_accessed = (
        x.size * x.dtype.itemsize + B * A * 4
        + sum(a.size * a.dtype.itemsize
              for a in (w1, b1, w2, b2, w3, b3, w4, b4)) + alphas.size * 4)

    outT = pl.pallas_call(
        functools.partial(mlp_kernel, chunk=chunk, n_chunks=n_chunks),
        out_shape=jax.ShapeDtypeStruct((A, B), jnp.float32),
        grid_spec=pltpu.PrefetchScalarGridSpec(
            num_scalar_prefetch=0,
            grid=(B // bm,),
            in_specs=[
                pl.BlockSpec(memory_space=pltpu.MemorySpace.SMEM),   # alphas
                pl.BlockSpec((bm, obs), lambda i: (i, 0)),           # x tile
                resident((H, obs)),  resident((H, 1)),
                resident((H2, H)),   resident((H2, 1)),
                resident((H4, H2)),  resident((H4, 1)),
                resident((A, H4)),   resident((A, 1)),
            ],
            out_specs=pl.BlockSpec((A, bm), lambda i: (0, i)),
        ),
        compiler_params=pltpu.CompilerParams(
            dimension_semantics=("parallel",),
            vmem_limit_bytes=32 * 1024 * 1024),
        cost_estimate=pl.CostEstimate(flops=flops, transcendentals=0,
                                      bytes_accessed=bytes_accessed),
    )(alphas, x, w1, b1, w2, b2, w3, b3, w4, b4)

    # Feature-major consumers can use outT directly; the tiny (A, B) -> (B, A)
    # transpose is fused under jit.
    return outT.T


policy_forward = jax.jit(_policy_forward, static_argnames=("block_b",))


def init_params(key, obs, action, hidden):
    """Deterministic init matching PyTorch nn.Linear default
    (U[-1/sqrt(fan_in), +1/sqrt(fan_in)]).  Weights stored in PyTorch
    (out_features, in_features) order; biases as (out_features, 1) columns."""
    dims = [(obs, hidden), (hidden, hidden // 2),
            (hidden // 2, hidden // 4), (hidden // 4, action)]
    layers = []
    for fan_in, fan_out in dims:
        key, kw, kb = jax.random.split(key, 3)
        bound = 1.0 / jnp.sqrt(fan_in)
        w = jax.random.uniform(kw, (fan_out, fan_in), jnp.float32, -bound, bound)
        b = jax.random.uniform(kb, (fan_out, 1), jnp.float32, -bound, bound)
        layers.append((w, b))
    alphas = jnp.full((3,), 0.25, dtype=jnp.float32)   # PReLU default slope
    return (alphas, *layers)


def prepare_params(params, compute_dtype=jnp.bfloat16):
    """One-time cast of weights to the MXU operand dtype (biases/alphas stay f32)."""
    alphas, *layers = params
    return (alphas, *[(w.astype(compute_dtype), b) for (w, b) in layers])


def policy_ref(x, params):
    """Pure-JAX reference of the same forward pass (f32)."""
    alphas, (w1, b1), (w2, b2), (w3, b3), (w4, b4) = params
    h = x @ w1.T + b1.T
    h = jnp.where(h > 0, h, alphas[0] * h)
    h = h @ w2.T + b2.T
    h = jnp.where(h > 0, h, alphas[1] * h)
    h = h @ w3.T + b3.T
    h = jnp.where(h > 0, h, alphas[2] * h)
    return h @ w4.T + b4.T


if __name__ == "__main__":
    key = jax.random.PRNGKey(0)
    obs_size, action_size, hidden_size = 16, 4, 32
    kx, kp = jax.random.split(key)
    params = init_params(kp, obs_size, action_size, hidden_size)

    # Small batch: bm=128 -> grid=(2,), single chunk per tile.
    batch = 256
    x = jax.random.normal(kx, (batch, obs_size), dtype=jnp.float32)
    ref = policy_ref(x, params)

    # f32-weight path: matches PyTorch f32 forward semantics tightly.
    out_f32 = jax.block_until_ready(
        policy_forward(x, prepare_params(params, jnp.float32)))
    assert out_f32.shape == (batch, action_size)
    assert jnp.allclose(out_f32, ref, atol=1e-4, rtol=1e-4), "f32 mismatch vs reference"

    # Default bf16 MXU-operand path (f32 accumulation): the memory-bound ~2x lever.
    # Note: activations are re-quantized to bf16 between layers, so this
    # intentionally diverges from bit-exact f32 parity; covered by tolerance.
    out_bf16 = jax.block_until_ready(
        policy_forward(x, prepare_params(params, jnp.bfloat16)))
    assert jnp.allclose(out_bf16, ref, atol=5e-2, rtol=5e-2), "bf16 mismatch vs reference"

    # Larger batch: bm=1024 -> grid=(4,) (>=2 steps per v7x TC), two 512-wide
    # lane chunks per tile exercising the in-kernel chunk loop.
    batch2 = 4096
    x2 = jax.random.normal(kx, (batch2, obs_size), dtype=jnp.float32)
    ref2 = policy_ref(x2, params)
    out2 = jax.block_until_ready(
        policy_forward(x2, prepare_params(params, jnp.bfloat16)))
    assert out2.shape == (batch2, action_size)
    assert jnp.allclose(out2, ref2, atol=5e-2, rtol=5e-2), "large-batch mismatch vs reference"

    print("KERNEL_OK")
</pallas_src>

<mosaic_0001>
module attributes {stable_mosaic.version = 11 : i64} {
  func.func @mlp_kernel(%arg0: i32, %arg1: memref<3xf32, #tpu.memory_space<smem>>, %arg2: memref<128x16xf32, #tpu.memory_space<vmem>>, %arg3: memref<32x16xf32, #tpu.memory_space<vmem>>, %arg4: memref<32x1xf32, #tpu.memory_space<vmem>>, %arg5: memref<16x32xf32, #tpu.memory_space<vmem>>, %arg6: memref<16x1xf32, #tpu.memory_space<vmem>>, %arg7: memref<8x16xf32, #tpu.memory_space<vmem>>, %arg8: memref<8x1xf32, #tpu.memory_space<vmem>>, %arg9: memref<4x8xf32, #tpu.memory_space<vmem>>, %arg10: memref<4x1xf32, #tpu.memory_space<vmem>>, %arg11: memref<4x128xf32, #tpu.memory_space<vmem>>) attributes {dimension_semantics = [#tpu.dimension_semantics<parallel>], iteration_bounds = array<i64: 2>, scalar_prefetch = 0 : i64, scratch_operands = 0 : i64, tpu.core_type = #tpu.core_type<tc>, window_params = [{transform_indices = @transform_0, window_bounds = array<i64: 3>}, {transform_indices = @transform_1, window_bounds = array<i64: 128, 16>}, {pipeline_mode = #tpu.pipeline_mode<synchronous>, transform_indices = @transform_2, window_bounds = array<i64: 32, 16>}, {pipeline_mode = #tpu.pipeline_mode<synchronous>, transform_indices = @transform_3, window_bounds = array<i64: 32, 1>}, {pipeline_mode = #tpu.pipeline_mode<synchronous>, transform_indices = @transform_4, window_bounds = array<i64: 16, 32>}, {pipeline_mode = #tpu.pipeline_mode<synchronous>, transform_indices = @transform_5, window_bounds = array<i64: 16, 1>}, {pipeline_mode = #tpu.pipeline_mode<synchronous>, transform_indices = @transform_6, window_bounds = array<i64: 8, 16>}, {pipeline_mode = #tpu.pipeline_mode<synchronous>, transform_indices = @transform_7, window_bounds = array<i64: 8, 1>}, {pipeline_mode = #tpu.pipeline_mode<synchronous>, transform_indices = @transform_8, window_bounds = array<i64: 4, 8>}, {pipeline_mode = #tpu.pipeline_mode<synchronous>, transform_indices = @transform_9, window_bounds = array<i64: 4, 1>}, {transform_indices = @transform_10, window_bounds = array<i64: 4, 128>}]} {
    %c0 = arith.constant 0 : index
    %0 = memref.load %arg1[%c0] : memref<3xf32, #tpu.memory_space<smem>>
    %c1 = arith.constant 1 : index
    %1 = memref.load %arg1[%c1] : memref<3xf32, #tpu.memory_space<smem>>
    %c2 = arith.constant 2 : index
    %2 = memref.load %arg1[%c2] : memref<3xf32, #tpu.memory_space<smem>>
    %c0_0 = arith.constant 0 : index
    %c0_1 = arith.constant 0 : index
    %3 = vector.load %arg3[%c0_0, %c0_1] : memref<32x16xf32, #tpu.memory_space<vmem>>, vector<32x16xf32>
    %c0_2 = arith.constant 0 : index
    %c0_3 = arith.constant 0 : index
    %4 = vector.load %arg4[%c0_2, %c0_3] : memref<32x1xf32, #tpu.memory_space<vmem>>, vector<32x1xf32>
    %c0_4 = arith.constant 0 : index
    %c0_5 = arith.constant 0 : index
    %5 = vector.load %arg5[%c0_4, %c0_5] : memref<16x32xf32, #tpu.memory_space<vmem>>, vector<16x32xf32>
    %c0_6 = arith.constant 0 : index
    %c0_7 = arith.constant 0 : index
    %6 = vector.load %arg6[%c0_6, %c0_7] : memref<16x1xf32, #tpu.memory_space<vmem>>, vector<16x1xf32>
    %c0_8 = arith.constant 0 : index
    %c0_9 = arith.constant 0 : index
    %7 = vector.load %arg7[%c0_8, %c0_9] : memref<8x16xf32, #tpu.memory_space<vmem>>, vector<8x16xf32>
    %c0_10 = arith.constant 0 : index
    %c0_11 = arith.constant 0 : index
    %8 = vector.load %arg8[%c0_10, %c0_11] : memref<8x1xf32, #tpu.memory_space<vmem>>, vector<8x1xf32>
    %c0_12 = arith.constant 0 : index
    %c0_13 = arith.constant 0 : index
    %9 = vector.load %arg9[%c0_12, %c0_13] : memref<4x8xf32, #tpu.memory_space<vmem>>, vector<4x8xf32>
    %c0_14 = arith.constant 0 : index
    %c0_15 = arith.constant 0 : index
    %10 = vector.load %arg10[%c0_14, %c0_15] : memref<4x1xf32, #tpu.memory_space<vmem>>, vector<4x1xf32>
    %c0_16 = arith.constant 0 : index
    %c0_17 = arith.constant 0 : index
    %11 = vector.load %arg2[%c0_16, %c0_17] : memref<128x16xf32, #tpu.memory_space<vmem>>, vector<128x16xf32>
    %cst = arith.constant dense<0.000000e+00> : vector<32x128xf32>
    %12 = tpu.matmul %3, %11, %cst {dimension_numbers = #tpu.dot_dimension_numbers<[1], [1], [0], [0], [0, 0, 1, 0], [], []>} : vector<32x16xf32>, vector<128x16xf32>, vector<32x128xf32> -> vector<32x128xf32>
    %13 = vector.broadcast %4 : vector<32x1xf32> to vector<32x128xf32>
    %14 = arith.addf %12, %13 : vector<32x128xf32>
    %cst_18 = arith.constant 0.000000e+00 : f32
    %15 = vector.broadcast %cst_18 : f32 to vector<32x128xf32>
    %16 = arith.cmpf ogt, %14, %15 : vector<32x128xf32>
    %17 = vector.broadcast %0 : f32 to vector<32x128xf32>
    %18 = arith.mulf %17, %14 : vector<32x128xf32>
    %19 = arith.select %16, %14, %18 : vector<32x128xi1>, vector<32x128xf32>
    %cst_19 = arith.constant dense<0.000000e+00> : vector<16x128xf32>
    %20 = tpu.matmul %5, %19, %cst_19 {dimension_numbers = #tpu.dot_dimension_numbers<[1], [0], [0], [1], [0, 0, 1, 1], [], []>} : vector<16x32xf32>, vector<32x128xf32>, vector<16x128xf32> -> vector<16x128xf32>
    %21 = vector.broadcast %6 : vector<16x1xf32> to vector<16x128xf32>
    %22 = arith.addf %20, %21 : vector<16x128xf32>
    %cst_20 = arith.constant 0.000000e+00 : f32
    %23 = vector.broadcast %cst_20 : f32 to vector<16x128xf32>
    %24 = arith.cmpf ogt, %22, %23 : vector<16x128xf32>
    %25 = vector.broadcast %1 : f32 to vector<16x128xf32>
    %26 = arith.mulf %25, %22 : vector<16x128xf32>
    %27 = arith.select %24, %22, %26 : vector<16x128xi1>, vector<16x128xf32>
    %cst_21 = arith.constant dense<0.000000e+00> : vector<8x128xf32>
    %28 = tpu.matmul %7, %27, %cst_21 {dimension_numbers = #tpu.dot_dimension_numbers<[1], [0], [0], [1], [0, 0, 1, 1], [], []>} : vector<8x16xf32>, vector<16x128xf32>, vector<8x128xf32> -> vector<8x128xf32>
    %29 = vector.broadcast %8 : vector<8x1xf32> to vector<8x128xf32>
    %30 = arith.addf %28, %29 : vector<8x128xf32>
    %cst_22 = arith.constant 0.000000e+00 : f32
    %31 = vector.broadcast %cst_22 : f32 to vector<8x128xf32>
    %32 = arith.cmpf ogt, %30, %31 : vector<8x128xf32>
    %33 = vector.broadcast %2 : f32 to vector<8x128xf32>
    %34 = arith.mulf %33, %30 : vector<8x128xf32>
    %35 = arith.select %32, %30, %34 : vector<8x128xi1>, vector<8x128xf32>
    %cst_23 = arith.constant dense<0.000000e+00> : vector<4x128xf32>
    %36 = tpu.matmul %9, %35, %cst_23 {dimension_numbers = #tpu.dot_dimension_numbers<[1], [0], [0], [1], [0, 0, 1, 1], [], []>} : vector<4x8xf32>, vector<8x128xf32>, vector<4x128xf32> -> vector<4x128xf32>
    %37 = vector.broadcast %10 : vector<4x1xf32> to vector<4x128xf32>
    %38 = arith.addf %36, %37 : vector<4x128xf32>
    %c0_24 = arith.constant 0 : index
    %c0_25 = arith.constant 0 : index
    %39 = vector.load %arg11[%c0_24, %c0_25] : memref<4x128xf32, #tpu.memory_space<vmem>>, vector<4x128xf32>
    tpu.vector_store %arg11[%c0_24, %c0_25], %38 {strides = array<i32>} : memref<4x128xf32, #tpu.memory_space<vmem>>, vector<4x128xf32>,
    return
  }
  func.func @transform_0(%arg0: i32) -> i32 {
    %c0_i32 = arith.constant 0 : i32
    %c0_i32_0 = arith.constant 0 : i32
    return %c0_i32 : i32
  }
  func.func @transform_1(%arg0: i32) -> (i32, i32) {
    %c0_i32 = arith.constant 0 : i32
    %c0_i32_0 = arith.constant 0 : i32
    return %arg0, %c0_i32 : i32, i32
  }
  func.func @transform_2(%arg0: i32) -> (i32, i32) {
    %c0_i32 = arith.constant 0 : i32
    %c0_i32_0 = arith.constant 0 : i32
    %c0_i32_1 = arith.constant 0 : i32
    return %c0_i32, %c0_i32_0 : i32, i32
  }
  func.func @transform_3(%arg0: i32) -> (i32, i32) {
    %c0_i32 = arith.constant 0 : i32
    %c0_i32_0 = arith.constant 0 : i32
    %c0_i32_1 = arith.constant 0 : i32
    return %c0_i32, %c0_i32_0 : i32, i32
  }
  func.func @transform_4(%arg0: i32) -> (i32, i32) {
    %c0_i32 = arith.constant 0 : i32
    %c0_i32_0 = arith.constant 0 : i32
    %c0_i32_1 = arith.constant 0 : i32
    return %c0_i32, %c0_i32_0 : i32, i32
  }
  func.func @transform_5(%arg0: i32) -> (i32, i32) {
    %c0_i32 = arith.constant 0 : i32
    %c0_i32_0 = arith.constant 0 : i32
    %c0_i32_1 = arith.constant 0 : i32
    return %c0_i32, %c0_i32_0 : i32, i32
  }
  func.func @transform_6(%arg0: i32) -> (i32, i32) {
    %c0_i32 = arith.constant 0 : i32
    %c0_i32_0 = arith.constant 0 : i32
    %c0_i32_1 = arith.constant 0 : i32
    return %c0_i32, %c0_i32_0 : i32, i32
  }
  func.func @transform_7(%arg0: i32) -> (i32, i32) {
    %c0_i32 = arith.constant 0 : i32
    %c0_i32_0 = arith.constant 0 : i32
    %c0_i32_1 = arith.constant 0 : i32
    return %c0_i32, %c0_i32_0 : i32, i32
  }
  func.func @transform_8(%arg0: i32) -> (i32, i32) {
    %c0_i32 = arith.constant 0 : i32
    %c0_i32_0 = arith.constant 0 : i32
    %c0_i32_1 = arith.constant 0 : i32
    return %c0_i32, %c0_i32_0 : i32, i32
  }
  func.func @transform_9(%arg0: i32) -> (i32, i32) {
    %c0_i32 = arith.constant 0 : i32
    %c0_i32_0 = arith.constant 0 : i32
    %c0_i32_1 = arith.constant 0 : i32
    return %c0_i32, %c0_i32_0 : i32, i32
  }
  func.func @transform_10(%arg0: i32) -> (i32, i32) {
    %c0_i32 = arith.constant 0 : i32
    %c0_i32_0 = arith.constant 0 : i32
    return %c0_i32, %arg0 : i32, i32
  }
}

</mosaic_0001>

<bundles_post_ra>
// kernel: _policy_forward.1
= control target key start
LH: loop header
LB: loop body
LE: loop exit
PB: predicated region body
PF: predicated region fallthrough
CT: control target
= control target key end

     0   :  { %s1136_s0 = inlined_call_operand.vmem [shape: f32[3], index: 0, kind: input, shape index: {}]   ;;  %s1137_s1 = inlined_call_operand.vmem [shape: f32[256,16], index: 1, kind: input, shape index: {}]   ;;  %s1138_s2 = inlined_call_operand.vmem [shape: f32[32,16], index: 2, kind: input, shape index: {}]   ;;  %s1139_s3 = inlined_call_operand.vmem [shape: f32[32,1], index: 3, kind: input, shape index: {}]   ;;  %s1140_s4 = inlined_call_operand.vmem [shape: f32[16,32], index: 4, kind: input, shape index: {}]   ;;  %s1141_s5 = inlined_call_operand.vmem [shape: f32[16,1], index: 5, kind: input, shape index: {}]   ;;  %s1142_s6 = inlined_call_operand.vmem [shape: f32[8,16], index: 6, kind: input, shape index: {}]   ;;  %s1143_s7 = inlined_call_operand.vmem [shape: f32[8,1], index: 7, kind: input, shape index: {}]   ;;  %s1144_s8 = inlined_call_operand.vmem [shape: f32[4,8], index: 8, kind: input, shape index: {}]   ;;  %s1145_s9 = inlined_call_operand.vmem [shape: f32[4,1], index: 9, kind: input, shape index: {}]   ;;  %s1146_s10 = inlined_call_operand.hbm [shape: f32[4,256], index: 10, kind: output, shape index: {}]  }
   0x1   :  { %1147 = sst [smem:[#allocation8_spill]] %s1136_s0 }
   0x2   :  { %15 = vsyncpa [#allocation4], 0 }
   0x3   :  { %16 = vsyncpa [#allocation3], 0 }
   0x4   :  { %18 = vsyncpa [#allocation3 + $0x1], 0  ;;  %s961_s13 = smov 0   ;;  %s963_s14 = smov 0  }
   0x5   :  { %s965_s15 = smov 0   ;;  %s967_s16 = smov 0  }
   0x6 LB: > { %s982_s17 = sadd.s32 4294967295, %s902_s16   ;;  %s728_s18 = sadd.s32 4294967294, %s902_s16   ;;  %s902_s16 = sphi %s967_s16, %s1154_s16   ;;  %s898_s15 = sphi %s965_s15, %s1153_s15   ;;  %s894_s14 = sphi %s963_s14, %s1152_s14   ;;  %s890_s13 = sphi %s961_s13, %s1151_s13  }
   0x7   : > { %s986_s19 = sadd.s32 1, %s902_s16   ;;  %s246_s20 = sadd.s32 1, %s898_s15 }
   0x8   : > { %s243_s21 = ssub.s32 %s902_s16, %s986_s19  ;;  %p256_p0 = scmp.ne.s32.totalorder %s898_s15, %s894_s14 }
   0x9   : > { %p244_p1 = scmp.eq.s32.totalorder %s243_s21, 0  ;;  %p257_p2 = scmp.eq.s32.totalorder %s982_s17, 1 }
   0xa   : > { %p262_p3 = scmp.ne.s32.totalorder %s894_s14, %s890_s13  ;;  %p263_p4 = scmp.eq.s32.totalorder %s728_s18, 1 }
   0xb   : > { %s997_s22 = scalar_select %p244_p1, %s898_s15, %s246_s20  }
   0xc   : > { %p999_p5 = por %p257_p2, %p256_p0  ;;  %p1003_p6 = por %p263_p4, %p262_p3 }
   0xd   : > { %p729_p7 = scmp.ge.s32.totalorder %s902_s16, 1  ;;  %p270_p8 = scmp.lt.s32.totalorder %s902_s16, 3 }
   0xe   : > { %p781_p9 = scmp.eq.s32.totalorder %s982_s17, 0  ;;  %s1150_s0 = sld [smem:[#allocation8_spill]] }
   0xf   : > { %p271_p10 = pnand %p729_p7, %p270_p8  ;;  %s904_s28 = smov [#allocation2]  }
  0x11   : > { %p773_p11 = pneg %p271_p10  ;;  %328 = sbr.rel (%p271_p10) target bundleno = 674 (0x2a2), region = 60 }
  0x13   : > { %p774_p12 = pnand %p781_p9, %p773_p11 }
  0x14   : > { %s282_s27 = sshll.u32 %s1150_s0, 4  ;;  %s283_s27 = int_to_ptr.vmem [resolvable:$true] %s282_s27 }
  0x15   : > { %776 = dma.vmem_to_smem (!%p774_p12), %s283_s27, 16, %s904_s28, [#allocation4]  }
  0x16   : > { %881 = dma.done.wait (%p781_p9), [#allocation4], 16  }
  0x17   : > { %883 = vsyncadd (%p781_p9), [#allocation4], 4294967280 }
  0x18   : > { %335 = sfence }
  0x19   : > { %s735_s29 = sshll.u32 %s982_s17, 4  ;;  %vm429_vm0 = vcmask 130048   ;;  %v382_v9 = vld [vmem:[%s1139_s3 + $0x8] sm:$0xff]  ;;  %v905_v10 = vmov 0   ;;  %v381_v13 = vld [vmem:[%s1139_s3] sm:$0xff]  ;;  %v384_v14 = vld [vmem:[%s1139_s3 + $0x18] sm:$0xff] }
  0x1a   : > { %p369_p13 = scmp.lt.s32.totalorder %s735_s29, 31  ;;  %819 = vset.pattern.permute.xlu1 %v905_v10  ;;  %818 = vset.pattern.permute.xlu0 %v905_v10  ;;  %v383_v17 = vld [vmem:[%s1139_s3 + $0x10] sm:$0xff]  ;;  %v390_v20 = vld [vmem:[%s1143_s7] sm:$0xff]  ;;  %v378_v24 = vld [vmem:[%s1138_s2 + $0x8] sm:$0xff]  ;;  %s374_s21 = sld [smem:[#allocation2]]  ;;  %vm542_vm5 = vcmask 261120  }
  0x1b   : > { %416 = vperm.xlu1 %819, %v382_v9   ;;  %820 = vset.pattern.permute.xlu2 %v905_v10  ;;  %v392_v21 = vld [vmem:[%s1145_s9] sm:$0xf]  ;;  %v379_v25 = vld [vmem:[%s1138_s2 + $0x10] sm:$0xff]  ;;  %v380_v26 = vld [vmem:[%s1138_s2 + $0x18] sm:$0xff]  ;;  %s738_s20 = sld [smem:[#allocation2 + $0x2]]  ;;  %vm616_vm9 = vcmask 64512  }
  0x1c   : > { %s1156_s29 = smov (!%p369_p13, %s735_s29), 31  ;;  %426 = vperm.xlu0 %818, %v384_v14   ;;  %v377_v23 = vld [vmem:[%s1138_s2] sm:$0xff]  ;;  %v388_v30 = vld [vmem:[%s1141_s5 + $0x8] sm:$0xff]  ;;  %s365_s26 = sand.u32 1, %s894_s14  }
  0x1d   : > { %s736_s30 = sshll.u32 %s1156_s29, 3  ;;  %539 = vperm.xlu2 %820, %v388_v30   ;;  %v387_v33 = vld [vmem:[%s1141_s5] sm:$0xff]  ;;  %v386_v51 = vld [vmem:[%s1140_s4 + $0x8] sm:$0xff]  ;;  %s734_s27 = sshll.u32 %s365_s26, 2 }
  0x1e   : > { %s1017_s18 = scalar_lea.vmem %s1137_s1, %s736_s30  ;;  %v385_v49 = vld [vmem:[%s1140_s4] sm:$0xff]  ;;  %s764_s28 = sshll.u32 %s982_s17, 2 }
  0x1f   : > { %v408_v0 = vld [vmem:[%s1017_s18 + $0x78] sm:$0xff]  ;;  %v407_v1 = vld [vmem:[%s1017_s18 + $0x70] sm:$0xff]  ;;  %v406_v2 = vld [vmem:[%s1017_s18 + $0x68] sm:$0xff]  ;;  %s367_s11 = scalar_lea.vmem [#allocation5], %s734_s27  ;;  %s856_s27 = scalar_lea.hbm %s1146_s10, 8 }
  0x20   : > { %739 = vmatpush.xpose.msk.msra.mxu0 %vm429_vm0, %v408_v0  ;;  %v405_v3 = vld [vmem:[%s1017_s18 + $0x60] sm:$0xff]  ;;  %v404_v4 = vld [vmem:[%s1017_s18 + $0x58] sm:$0xff]  ;;  %v403_v5 = vld [vmem:[%s1017_s18 + $0x50] sm:$0xff]  ;;  %v523_v40 = vstv %s374_s21  ;;  %s654_s12 = sshll.u32 %s367_s11, 4  ;;  %s642_s21 = scalar_lea.sflag [#allocation3], %s365_s26  ;;  %s655_s12 = int_to_ptr.vmem [resolvable:$true] %s654_s12 }
  0x21   : > { %v402_v6 = vld [vmem:[%s1017_s18 + $0x48] sm:$0xff]  ;;  %v401_v7 = vld [vmem:[%s1017_s18 + $0x40] sm:$0xff]  ;;  %v400_v8 = vld [vmem:[%s1017_s18 + $0x38] sm:$0xff] }
  0x22   : > { %v399_v11 = vld [vmem:[%s1017_s18 + $0x30] sm:$0xff]  ;;  %v398_v12 = vld [vmem:[%s1017_s18 + $0x28] sm:$0xff]  ;;  %v397_v15 = vld [vmem:[%s1017_s18 + $0x20] sm:$0xff] }
  0x23   : > { %411 = vperm.xlu1 %819, %v381_v13   ;;  %v396_v16 = vld [vmem:[%s1017_s18 + $0x18] sm:$0xff]  ;;  %v395_v18 = vld [vmem:[%s1017_s18 + $0x10] sm:$0xff]  ;;  %v394_v19 = vld [vmem:[%s1017_s18 + $0x8] sm:$0xff] }
  0x24   : > { %740 = vmatpush.xpose.msk.msra.mxu0 %vm429_vm0, %v407_v1  ;;  %421 = vperm.xlu0 %818, %v383_v17   ;;  %v393_v22 = vld [vmem:[%s1017_s18] sm:$0xff]  ;;  %s737_s18 = sld [smem:[#allocation2 + $0x1]] }
  0x25   : > { %534 = vperm.xlu2 %820, %v387_v33   ;;  %v389_v62 = vld [vmem:[%s1142_s6] sm:$0xff] }
  0x28   : > { %741 = vmatpush.xpose.msk.msra.mxu0 %vm429_vm0, %v406_v2  ;;  %v608_v2 = vstv %s738_s20 }
  0x2a   : > { %v574_v57 = vstv %s737_s18  ;;  %s652_s18 = scalar_lea.hbm %s1146_s10, %s764_s28 }
  0x2b   : > { %613 = vperm.xlu1 %819, %v392_v21   ;;  %s656_s20 = sshll.u32 %s652_s18, 4  ;;  %s657_s20 = int_to_ptr.hbm [resolvable:$true] %s656_s20 }
  0x2c   : > { %742 = vmatpush.xpose.msk.msra.mxu0 %vm429_vm0, %v405_v3  ;;  %581 = vperm.xlu0 %818, %v390_v20   ;;  %s850_s25 = sshra.s32 %s657_s20, 4  ;;  %s851_s25 = int_to_ptr.hbm [resolvable:$true] %s850_s25 }
  0x2d   : > { %s852_s0 = scalar_lea.hbm %s851_s25, 4  ;;  %p857_p3 = scmp.lt.s32.totalorder %s851_s25, %s1146_s10 }
  0x2e   : > { %p853_p0 = scmp.ne.s32.totalorder %s851_s25, %s852_s0  ;;  %p858_p4 = scmp.lt.s32.totalorder %s856_s27, %s852_s0 }
  0x30   : > { %743 = vmatpush.xpose.msk.msra.mxu0 %vm429_vm0, %v404_v4  ;;  %p854_p1 = pnand %p853_p0, %p999_p5  ;;  %p859_p7 = por %p858_p4, %p857_p3 }
  0x32   : > { %p855_p2 = pneg %p854_p1 }
  0x34   : > { %744 = vmatpush.xpose.msk.msra.mxu0 %vm429_vm0, %v403_v5  ;;  %v391_v5 = vld [vmem:[%s1144_s8] sm:$0xf]  ;;  %p860_p8 = pnand %p859_p7, %p855_p2 }
  0x38   : > { %745 = vmatpush.xpose.msk.msra.mxu0 %vm429_vm0, %v402_v6 }
  0x3c   : > { %746 = vmatpush.xpose.msk.msra.mxu0 %vm429_vm0, %v401_v7 }
  0x40   : > { %747 = vmatpush.xpose.msk.msra.mxu0 %vm429_vm0, %v400_v8 }
  0x44   : > { %748 = vmatpush.xpose.msk.msra.mxu0 %vm429_vm0, %v399_v11 }
  0x48   : > { %749 = vmatpush.xpose.msk.msra.mxu0 %vm429_vm0, %v398_v12 }
  0x4c   : > { %750 = vmatpush.xpose.msk.msra.mxu0 %vm429_vm0, %v397_v15 }
  0x50   : > { %751 = vmatpush.xpose.msk.msra.mxu0 %vm429_vm0, %v396_v16 }
  0x54   : > { %752 = vmatpush.xpose.msk.msra.mxu0 %vm429_vm0, %v395_v18 }
  0x58   : > { %753 = vmatpush.xpose.msk.msra.mxu0 %vm429_vm0, %v394_v19 }
  0x5c   : > { %754 = vmatpush.xpose.msk.msra.mxu0 %vm429_vm0, %v393_v22 }
  0x5f   : > { %755 = vmatmul.msk.f32.vlgmr.msra.gmra.mxu0 %vm429_vm0, %v377_v23 }
  0x67   : > { %756 = vmatmul.msk.f32.gmra.mxu0 %vm429_vm0, %v378_v24 }
  0x6f   : > { %757 = vmatmul.msk.f32.gmra.mxu0 %vm429_vm0, %v379_v25 }
  0x77   : > { %758 = vmatmul.msk.f32.gmra.mxu0 %vm429_vm0, %v380_v26  ;;  %v540_v52 = vpop.permute.xlu2 %539 }
  0x7f   : > { %v535_v54 = vpop.permute.xlu2 %534 }
  0x8d   : > { %v417_v31 = vpop.permute.xlu1 %416 }
  0x8e   : > { %v427_v29 = vpop.permute.xlu0 %426 }
  0x95   : > { %v412_v36 = vpop.permute.xlu1 %411 }
  0x96   : > { %v422_v34 = vpop.permute.xlu0 %421 }
  0x9d   : > { %v614_v7 = vpop.permute.xlu1 %613 }
  0x9e   : > { %v582_v0 = vpop.permute.xlu0 %581 }
  0xdc   : > { %v507_v27 = vpop.f32.mrf.mxu0 }
  0xdd   : > { %v508_v41 = vadd.f32 %v507_v27, %v412_v36 }
  0xdf   : > { %v524_v47 = vmul.f32 %v523_v40, %v508_v41  ;;  %vm519_vm4 = vcmp.gt.f32.partialorder %v508_v41, 0.0 }
  0xe1   : > { %v528_v50 = vsel %vm519_vm4, %v508_v41, %v524_v47 }
  0xe4   : > { %v510_v28 = vpop.f32.mrf.mxu0 }
  0xe5   : > { %v511_v38 = vadd.f32 %v510_v28, %v417_v31 }
  0xe7   : > { %v525_v45 = vmul.f32 %v523_v40, %v511_v38  ;;  %vm520_vm3 = vcmp.gt.f32.partialorder %v511_v38, 0.0 }
  0xe9   : > { %v529_v48 = vsel %vm520_vm3, %v511_v38, %v525_v45 }
  0xec   : > { %v513_v32 = vpop.f32.mrf.mxu0 }
  0xed   : > { %v514_v35 = vadd.f32 %v513_v32, %v422_v34 }
  0xef   : > { %v526_v43 = vmul.f32 %v523_v40, %v514_v35  ;;  %vm521_vm2 = vcmp.gt.f32.partialorder %v514_v35, 0.0 }
  0xf1   : > { %v530_v46 = vsel %vm521_vm2, %v514_v35, %v526_v43 }
  0xf4   : > { %v516_v37 = vpop.f32.mrf.mxu0 }
  0xf5   : > { %v517_v39 = vadd.f32 %v516_v37, %v427_v29 }
  0xf7   : > { %vm522_vm1 = vcmp.gt.f32.partialorder %v517_v39, 0.0  ;;  %v527_v42 = vmul.f32 %v523_v40, %v517_v39 }
  0xf9   : > { %v531_v44 = vsel %vm522_vm1, %v517_v39, %v527_v42 }
  0xfa   : > { %561 = vmatpush.msra.mxu1 %v531_v44 }
  0xfc   : > { %562 = vmatpush.msra.mxu1 %v530_v46 }
  0xfe   : > { %563 = vmatpush.msra.mxu1 %v529_v48 }
 0x100   : > { %564 = vmatpush.msra.mxu1 %v528_v50 }
 0x101   : > { %759 = vmatmul.msk.f32.vlgmr.msra.gmra.mxu1 %vm542_vm5, %v385_v49 }
 0x109   : > { %760 = vmatmul.msk.f32.gmra.mxu1 %vm542_vm5, %v386_v51 }
 0x17e   : > { %v566_v53 = vpop.f32.mrf.mxu1 }
 0x17f   : > { %v567_v55 = vadd.f32 %v566_v53, %v535_v54 }
 0x181   : > { %v575_v60 = vmul.f32 %v574_v57, %v567_v55  ;;  %vm572_vm7 = vcmp.gt.f32.partialorder %v567_v55, 0.0 }
 0x183   : > { %v577_v63 = vsel %vm572_vm7, %v567_v55, %v575_v60 }
 0x186   : > { %v569_v56 = vpop.f32.mrf.mxu1 }
 0x187   : > { %v570_v58 = vadd.f32 %v569_v56, %v540_v52 }
 0x189   : > { %vm573_vm6 = vcmp.gt.f32.partialorder %v570_v58, 0.0  ;;  %v576_v59 = vmul.f32 %v574_v57, %v570_v58 }
 0x18b   : > { %v578_v61 = vsel %vm573_vm6, %v570_v58, %v576_v59 }
 0x18c   : > { %601 = vmatpush.msra.mxu2 %v578_v61 }
 0x18e   : > { %602 = vmatpush.msra.mxu2 %v577_v63 }
 0x18f   : > { %761 = vmatmul.msk.f32.vlgmr.msra.gmra.mxu2 %vm429_vm0, %v389_v62 }
 0x212   : > { %v604_v1 = vpop.f32.mrf.mxu2 }
 0x213   : > { %v605_v3 = vadd.f32 %v604_v1, %v582_v0 }
 0x215   : > { %vm607_vm8 = vcmp.gt.f32.partialorder %v605_v3, 0.0  ;;  %v609_v4 = vmul.f32 %v608_v2, %v605_v3 }
 0x217   : > { %v610_v6 = vsel %vm607_vm8, %v605_v3, %v609_v4 }
 0x218   : > { %635 = vmatpush.msra.mxu3 %v610_v6 }
 0x219   : > { %762 = vmatmul.msk.f32.vlgmr.msra.gmra.mxu3 %vm616_vm9, %v391_v5 }
 0x29c   : > { %v637_v8 = vpop.f32.mrf.mxu3 }
 0x29d   : > { %v638_v9 = vadd.f32 %v637_v8, %v614_v7 }
 0x29f   : > { %640 = vst [vmem:[%s367_s11] sm:$0xf] %v638_v9 }
 0x2a0   : > { %863 = shalt.err (!%p860_p8)
}
 0x2a1   : > { %771 = dma.vmem_to_hbm [thread:$0]  (%p999_p5), %s655_s12, 64, %s657_s20, %s642_s21  }
 0x2a2 PF: > { %p783_p9 = scmp.ge.s32.totalorder %s902_s16, 2  ;;  %s668_s26 = sand.u32 1, %s890_s13  }
 0x2a3   : > { %s669_s18 = scalar_lea.sflag [#allocation3], %s668_s26 }
 0x2a4   : > { %p778_p10 = pnand %p783_p9, %p1003_p6 }
 0x2a6   : > { %p779_p11 = pneg %p778_p10 }
 0x2a8   : > { %885 = dma.done.wait (%p779_p11), %s669_s18, 64  }
 0x2a9   : > { %887 = vsyncadd (%p779_p11), %s669_s18, 4294967232  ;;  %p21_p12 = scmp.ge.s32.totalorder %s986_s19, 4   ;;  %s1151_s13 = smov %s894_s14 }
 0x2aa   : > { %s1152_s14 = smov %s898_s15  ;;  %s1153_s15 = smov %s997_s22 }
 0x2ab   : > { %s1154_s16 = smov %s986_s19  ;;  %23 = sbr.rel (!%p21_p12) target bundleno = 6 (0x6), region = 100 }
 0x2b0   :  { %675 = vsyncpa [#allocation3], 1 }
 0x2b1   :  { %677 = vsyncpa [#allocation3 + $0x1], 1 }
 0x2b2   :  { %678 = vsyncpa [#allocation4], 1 }
 0x2b3   :  { %680 = vsyncpa [#allocation4 + $0x1], 1 }

</bundles_post_ra>
